<compile_context>
chip_gen: v7x
topology: tpu7x:2x2x1
jax: 0.10.0
libtpu: 0.0.40
codegen_flags: <defaults>
</compile_context>

<pallas_src>
import jax
import jax.numpy as jnp
from jax.experimental import pallas as pl
from jax.experimental.pallas import tpu as pltpu


def gaussian_kernel(params_ref, x_ref, o_ref):
    # params_ref: SMEM (3, n_eff) rows = [scaled_amp, center, neg_inv_2w2]
    # x_ref/o_ref: VMEM (tile_r, LANE) lane-dense tiles of the flattened x / y.
    n_eff = params_ref.shape[1]

    # Hoist all scalar SMEM reads before the unrolled compute loop.
    amps = [params_ref[0, i] for i in range(n_eff)]
    ctrs = [params_ref[1, i] for i in range(n_eff)]
    scls = [params_ref[2, i] for i in range(n_eff)]

    x = x_ref[...].astype(jnp.float32)
    acc = jnp.zeros(x.shape, jnp.float32)
    # Static unrolled loop over at most 5 peaks (wrapper slices to min(n,5)).
    # Peaks beyond the (data-dependent) rounded peak count contribute exactly
    # zero: their amplitude is pre-multiplied by 0 and their exponent scale is
    # a safe finite constant, so 0 * exp(finite) == 0.
    for i in range(n_eff):
        d = x - ctrs[i]
        acc = acc + amps[i] * jnp.exp(d * d * scls[i])
    o_ref[...] = acc.astype(o_ref.dtype)


def _choose_tile_r(rows, row_bytes, sublane,
                   max_block_bytes=4 * 1024 * 1024, min_blocks=2):
    """Row-tile size (in rows of the lane-dense slab).

    Keeps one block <= max_block_bytes, makes tile_r a multiple of the
    dtype-appropriate sublane count, and caps it so the grid has at least
    `min_blocks` blocks when the data is large enough (megacore sharding on
    v7x, and keeps the pipeline busy).  Tiny inputs collapse to one
    full-extent block (allowed by the (8,128) rule).
    """
    cap = max(1, max_block_bytes // row_bytes)
    cap = max(sublane, (cap // sublane) * sublane)
    target = pl.cdiv(rows, min_blocks)
    target = pl.cdiv(target, sublane) * sublane
    tile_r = min(cap, target)
    if tile_r >= rows:
        return rows  # single block covering the full row extent
    return tile_r


def gaussian_forward(x, amplitude, center, width, n_peaks_param,
                     lane=1024, max_block_bytes=4 * 1024 * 1024):
    orig_shape = x.shape
    orig_dtype = x.dtype
    n_elems = x.size
    n_peaks = amplitude.shape[0]
    # clamp(1, 5) guarantees peaks beyond index 4 can never be active.
    n_eff = min(n_peaks, 5)

    # torch.round(torch.clamp(n_peaks_param, 1, 5)).int()
    k = jnp.round(jnp.clip(n_peaks_param.astype(jnp.float32), 1.0, 5.0))
    k = k.astype(jnp.int32)
    mask = (jnp.arange(n_eff) < k).astype(jnp.float32)

    amp_f = amplitude[:n_eff].astype(jnp.float32) * mask
    ctr_f = center[:n_eff].astype(jnp.float32)
    wid_f = width[:n_eff].astype(jnp.float32)
    neg_inv_2w2 = -1.0 / (2.0 * wid_f * wid_f)
    # Finite exponent scale for inactive peaks -> no NaN leakage from
    # 0 * exp(inf) when a masked peak has width == 0.
    neg_inv_2w2 = jnp.where(mask > 0.0, neg_inv_2w2, -1.0)
    params = jnp.stack([amp_f, ctr_f, neg_inv_2w2], axis=0)  # (3, n_eff)

    # Flatten to a lane-dense (rows, lane) slab, zero-padding the tail.
    itemsize = jnp.dtype(orig_dtype).itemsize
    sublane = max(8, 32 // itemsize)  # 8 for f32, 16 for bf16, 32 for int8
    rows = max(1, pl.cdiv(n_elems, lane))
    row_bytes = lane * itemsize
    tile_r = _choose_tile_r(rows, row_bytes, sublane, max_block_bytes)
    grid_r = pl.cdiv(rows, tile_r)
    rows_padded = grid_r * tile_r
    n_padded = rows_padded * lane

    x_flat = x.reshape(-1)
    if n_padded != n_elems:
        x_flat = jnp.pad(x_flat, (0, n_padded - n_elems))
    x2d = x_flat.reshape(rows_padded, lane)

    y2d = pl.pallas_call(
        gaussian_kernel,
        out_shape=jax.ShapeDtypeStruct((rows_padded, lane), orig_dtype),
        grid=(grid_r,),
        in_specs=[
            pl.BlockSpec(memory_space=pltpu.MemorySpace.SMEM),  # params, untiled
            pl.BlockSpec((tile_r, lane), lambda i: (i, 0)),
        ],
        out_specs=pl.BlockSpec((tile_r, lane), lambda i: (i, 0)),
        compiler_params=pltpu.CompilerParams(
            dimension_semantics=("parallel",),
            vmem_limit_bytes=64 << 20,
        ),
    )(params, x2d)

    return y2d.reshape(-1)[:n_elems].reshape(orig_shape)


def gaussian_reference(x, amplitude, center, width, n_peaks_param):
    # Pure-JAX reference mirroring the PyTorch forward (loop-skip semantics).
    # Host-side rounding (test-only; not meant to be jitted).
    k = int(round(min(max(float(n_peaks_param), 1.0), 5.0)))
    k = min(k, amplitude.shape[0])
    xf = x.astype(jnp.float32)
    y = jnp.zeros_like(xf)
    for i in range(k):
        y = y + amplitude[i] * jnp.exp(
            -(xf - center[i]) ** 2 / (2.0 * width[i] ** 2))
    return y.astype(x.dtype)


if __name__ == "__main__":
    n_peaks = 3
    key = jax.random.PRNGKey(0)
    k_amp, k_ctr, k_wid, k_x1, k_x2 = jax.random.split(key, 5)

    # Deterministic "randn"-style parameter init (matches __init__ shapes).
    amplitude = jax.random.normal(k_amp, (n_peaks,), dtype=jnp.float32)
    center = jax.random.normal(k_ctr, (n_peaks,), dtype=jnp.float32)
    width = jnp.abs(jax.random.normal(k_wid, (n_peaks,), dtype=jnp.float32))
    n_peaks_param = jnp.float32(n_peaks)

    # Test 1: small, awkwardly shaped signal (exercises lane padding and the
    # single-block path).
    x1 = jax.random.normal(k_x1, (3, 500), dtype=jnp.float32) * 3.0
    y1 = jax.block_until_ready(
        gaussian_forward(x1, amplitude, center, width, n_peaks_param))
    y1_ref = gaussian_reference(x1, amplitude, center, width, n_peaks_param)
    assert y1.shape == x1.shape and y1.dtype == x1.dtype
    assert jnp.allclose(y1, y1_ref, atol=1e-5, rtol=1e-5), "mismatch (f32 small)"

    # Test 2: larger signal that produces a multi-block row grid.
    x2 = jax.random.normal(k_x2, (40, 700), dtype=jnp.float32) * 3.0
    y2 = jax.block_until_ready(
        gaussian_forward(x2, amplitude, center, width, n_peaks_param))
    y2_ref = gaussian_reference(x2, amplitude, center, width, n_peaks_param)
    assert jnp.allclose(y2, y2_ref, atol=1e-5, rtol=1e-5), "mismatch (f32 multi-block)"

    # Test 3: bf16 input smoke test (f32 accumulate, cast on store).
    x3 = x1.astype(jnp.bfloat16)
    y3 = jax.block_until_ready(
        gaussian_forward(x3, amplitude, center, width, n_peaks_param))
    y3_ref = gaussian_reference(x3, amplitude, center, width, n_peaks_param)
    assert y3.dtype == jnp.bfloat16
    assert jnp.allclose(y3.astype(jnp.float32), y3_ref.astype(jnp.float32),
                        atol=5e-2, rtol=5e-2), "mismatch (bf16)"

    print("KERNEL_OK")
</pallas_src>

<mosaic_0001>
module attributes {stable_mosaic.version = 11 : i64} {
  func.func @gaussian_kernel(%arg0: i32, %arg1: memref<3x3xf32, #tpu.memory_space<smem>>, %arg2: memref<2x1024xf32, #tpu.memory_space<vmem>>, %arg3: memref<2x1024xf32, #tpu.memory_space<vmem>>) attributes {dimension_semantics = [#tpu.dimension_semantics<parallel>], iteration_bounds = array<i64: 1>, scalar_prefetch = 0 : i64, scratch_operands = 0 : i64, tpu.core_type = #tpu.core_type<tc>, window_params = [{transform_indices = @transform_0, window_bounds = array<i64: 3, 3>}, {transform_indices = @transform_1, window_bounds = array<i64: 2, 1024>}, {transform_indices = @transform_2, window_bounds = array<i64: 2, 1024>}]} {
    %c0 = arith.constant 0 : index
    %c0_0 = arith.constant 0 : index
    %0 = memref.load %arg1[%c0, %c0_0] : memref<3x3xf32, #tpu.memory_space<smem>>
    %c0_1 = arith.constant 0 : index
    %c1 = arith.constant 1 : index
    %1 = memref.load %arg1[%c0_1, %c1] : memref<3x3xf32, #tpu.memory_space<smem>>
    %c0_2 = arith.constant 0 : index
    %c2 = arith.constant 2 : index
    %2 = memref.load %arg1[%c0_2, %c2] : memref<3x3xf32, #tpu.memory_space<smem>>
    %c1_3 = arith.constant 1 : index
    %c0_4 = arith.constant 0 : index
    %3 = memref.load %arg1[%c1_3, %c0_4] : memref<3x3xf32, #tpu.memory_space<smem>>
    %c1_5 = arith.constant 1 : index
    %c1_6 = arith.constant 1 : index
    %4 = memref.load %arg1[%c1_5, %c1_6] : memref<3x3xf32, #tpu.memory_space<smem>>
    %c1_7 = arith.constant 1 : index
    %c2_8 = arith.constant 2 : index
    %5 = memref.load %arg1[%c1_7, %c2_8] : memref<3x3xf32, #tpu.memory_space<smem>>
    %c2_9 = arith.constant 2 : index
    %c0_10 = arith.constant 0 : index
    %6 = memref.load %arg1[%c2_9, %c0_10] : memref<3x3xf32, #tpu.memory_space<smem>>
    %c2_11 = arith.constant 2 : index
    %c1_12 = arith.constant 1 : index
    %7 = memref.load %arg1[%c2_11, %c1_12] : memref<3x3xf32, #tpu.memory_space<smem>>
    %c2_13 = arith.constant 2 : index
    %c2_14 = arith.constant 2 : index
    %8 = memref.load %arg1[%c2_13, %c2_14] : memref<3x3xf32, #tpu.memory_space<smem>>
    %c0_15 = arith.constant 0 : index
    %c0_16 = arith.constant 0 : index
    %9 = vector.load %arg2[%c0_15, %c0_16] : memref<2x1024xf32, #tpu.memory_space<vmem>>, vector<2x1024xf32>
    %cst = arith.constant 0.000000e+00 : f32
    %10 = vector.broadcast %cst : f32 to vector<2x1024xf32>
    %11 = vector.broadcast %3 : f32 to vector<2x1024xf32>
    %12 = arith.subf %9, %11 : vector<2x1024xf32>
    %13 = arith.mulf %12, %12 : vector<2x1024xf32>
    %14 = vector.broadcast %6 : f32 to vector<2x1024xf32>
    %15 = arith.mulf %13, %14 : vector<2x1024xf32>
    %16 = math.exp %15 : vector<2x1024xf32>
    %17 = vector.broadcast %0 : f32 to vector<2x1024xf32>
    %18 = arith.mulf %17, %16 : vector<2x1024xf32>
    %19 = arith.addf %10, %18 : vector<2x1024xf32>
    %20 = vector.broadcast %4 : f32 to vector<2x1024xf32>
    %21 = arith.subf %9, %20 : vector<2x1024xf32>
    %22 = arith.mulf %21, %21 : vector<2x1024xf32>
    %23 = vector.broadcast %7 : f32 to vector<2x1024xf32>
    %24 = arith.mulf %22, %23 : vector<2x1024xf32>
    %25 = math.exp %24 : vector<2x1024xf32>
    %26 = vector.broadcast %1 : f32 to vector<2x1024xf32>
    %27 = arith.mulf %26, %25 : vector<2x1024xf32>
    %28 = arith.addf %19, %27 : vector<2x1024xf32>
    %29 = vector.broadcast %5 : f32 to vector<2x1024xf32>
    %30 = arith.subf %9, %29 : vector<2x1024xf32>
    %31 = arith.mulf %30, %30 : vector<2x1024xf32>
    %32 = vector.broadcast %8 : f32 to vector<2x1024xf32>
    %33 = arith.mulf %31, %32 : vector<2x1024xf32>
    %34 = math.exp %33 : vector<2x1024xf32>
    %35 = vector.broadcast %2 : f32 to vector<2x1024xf32>
    %36 = arith.mulf %35, %34 : vector<2x1024xf32>
    %37 = arith.addf %28, %36 : vector<2x1024xf32>
    %c0_17 = arith.constant 0 : index
    %c0_18 = arith.constant 0 : index
    %38 = vector.load %arg3[%c0_17, %c0_18] : memref<2x1024xf32, #tpu.memory_space<vmem>>, vector<2x1024xf32>
    tpu.vector_store %arg3[%c0_17, %c0_18], %37 {strides = array<i32>} : memref<2x1024xf32, #tpu.memory_space<vmem>>, vector<2x1024xf32>,
    return
  }
  func.func @transform_0(%arg0: i32) -> (i32, i32) {
    %c0_i32 = arith.constant 0 : i32
    %c0_i32_0 = arith.constant 0 : i32
    %c0_i32_1 = arith.constant 0 : i32
    return %c0_i32, %c0_i32_0 : i32, i32
  }
  func.func @transform_1(%arg0: i32) -> (i32, i32) {
    %c0_i32 = arith.constant 0 : i32
    %c0_i32_0 = arith.constant 0 : i32
    return %arg0, %c0_i32 : i32, i32
  }
  func.func @transform_2(%arg0: i32) -> (i32, i32) {
    %c0_i32 = arith.constant 0 : i32
    %c0_i32_0 = arith.constant 0 : i32
    return %arg0, %c0_i32 : i32, i32
  }
}

</mosaic_0001>

<bundles_post_ra>
// kernel: tpu_custom_call.1
= control target key start
LH: loop header
LB: loop body
LE: loop exit
PB: predicated region body
PF: predicated region fallthrough
CT: control target
= control target key end

     0   :  { %7 = vsyncpa [#allocation5], 0  ;;  %s252_s0 = inlined_call_operand.hbm [shape: f32[3,3], index: 0, kind: input, shape index: {}]   ;;  %s253_s1 = inlined_call_operand.hbm [shape: f32[2,1024], index: 1, kind: input, shape index: {}]   ;;  %s254_s2 = inlined_call_operand.hbm [shape: f32[2,1024], index: 2, kind: output, shape index: {}]  }
   0x1   :  { %8 = vsyncpa [#allocation3], 0 }
   0x2   :  { %9 = vsyncpa [#allocation4], 0  ;;  %s138_s11 = scalar_lea.hbm %s252_s0, 64 }
   0x3   :  { %p139_p0 = scmp.ne.s32.totalorder %s252_s0, %s138_s11  ;;  %p142_p1 = scmp.lt.u32.totalorder %s138_s11, %s252_s0 }
   0x5   :  { %p144_p2 = pnand %p142_p1, %p139_p0 }
   0x7   :  { %147 = shalt.err (!%p144_p2)
}
   0x8   :  { %s198_s16 = smov [#allocation2]   ;;  %s199_s19 = smov [#allocation6]  }
   0x9   :  { %17 = dma.hbm_to_smem %s252_s0, 64, %s198_s16, [#allocation5]  }
   0xa   :  { %s24_s20 = sshll.u32 %s199_s19, 4  ;;  %s148_s23 = scalar_lea.hbm %s253_s1, 256  ;;  %s25_s20 = int_to_ptr.vmem [resolvable:$true] %s24_s20 }
   0xb   :  { %p149_p3 = scmp.ne.s32.totalorder %s253_s1, %s148_s23  ;;  %p152_p4 = scmp.lt.u32.totalorder %s148_s23, %s253_s1 }
   0xd   :  { %p154_p5 = pnand %p152_p4, %p149_p3 }
   0xf   :  { %157 = shalt.err (!%p154_p5)
}
  0x10   :  { %s158_s28 = scalar_lea.vmem %s25_s20, 256  ;;  %p163_p7 = scmp.lt.s32.totalorder %s25_s20, %s25_s20 }
  0x11   :  { %p159_p6 = scmp.ne.s32.totalorder %s25_s20, %s158_s28  ;;  %p164_p8 = scmp.lt.s32.totalorder %s158_s28, %s158_s28 }
  0x13   :  { %p165_p9 = por %p164_p8, %p163_p7 }
  0x15   :  { %p166_p10 = pnand %p165_p9, %p159_p6 }
  0x17   :  { %169 = shalt.err (!%p166_p10)
}
  0x18   :  { %27 = dma.hbm_to_vmem [thread:$0]  %s253_s1, 256, %s25_s20, [#allocation3]  }
  0x19   :  { %192 = dma.done.wait [#allocation5], 64  }
  0x1a   :  { %193 = vsyncadd [#allocation5], 4294967232 }
  0x1b   :  { %194 = dma.done.wait [#allocation3], 256  }
  0x1c   :  { %195 = vsyncadd [#allocation3], 4294967040 }
  0x1d   :  { %34 = sfence }
  0x1e   :  { %s117_s30 = sld [smem:[#allocation2 + $0x80]]  ;;  %s118_s3 = sld [smem:[#allocation2 + $0x81]]  ;;  %v44_v0 = vld [vmem:[#allocation6] sm:$0xff]  ;;  %v45_v1 = vld [vmem:[#allocation6 + $0x8] sm:$0xff] }
  0x1f   :  { %s119_s4 = sld [smem:[#allocation2 + $0x82]]  ;;  %s120_s5 = sld [smem:[#allocation2 + $0x100]] }
  0x20   :  { %s121_s6 = sld [smem:[#allocation2 + $0x101]]  ;;  %s122_s7 = sld [smem:[#allocation2 + $0x102]] }
  0x21   :  { %s35_s1 = sld [smem:[#allocation2]]  ;;  %s115_s8 = sld [smem:[#allocation2 + $0x1]] }
  0x22   :  { %s116_s9 = sld [smem:[#allocation2 + $0x2]]  ;;  %s200_s10 = smov [#allocation7]  }
  0x23   :  { %s105_s11 = sshll.u32 %s200_s10, 4  ;;  %s106_s11 = int_to_ptr.vmem [resolvable:$true] %s105_s11 }
  0x24   :  { %v46_v2 = vstv %s117_s30  ;;  %v63_v4 = vstv %s118_s3  ;;  %s170_s12 = scalar_lea.vmem %s106_s11, 256  ;;  %p175_p12 = scmp.lt.s32.totalorder %s106_s11, %s106_s11 }
  0x25   :  { %v47_v3 = vsub.f32 %v44_v0, %v46_v2  ;;  %v80_v5 = vstv %s119_s4  ;;  %v48_v6 = vsub.f32 %v45_v1, %v46_v2  ;;  %v51_v7 = vstv %s120_s5  ;;  %p171_p11 = scmp.ne.s32.totalorder %s106_s11, %s170_s12  ;;  %p176_p13 = scmp.lt.s32.totalorder %s170_s12, %s170_s12 }
  0x26   :  { %v64_v8 = vsub.f32 %v44_v0, %v63_v4  ;;  %v68_v9 = vstv %s121_s6  ;;  %v81_v10 = vsub.f32 %v44_v0, %v80_v5  ;;  %v85_v12 = vstv %s122_s7 }
  0x27   :  { %v49_v11 = vmul.f32 %v47_v3, %v47_v3  ;;  %v50_v13 = vmul.f32 %v48_v6, %v48_v6  ;;  %v65_v14 = vsub.f32 %v45_v1, %v63_v4  ;;  %v82_v17 = vsub.f32 %v45_v1, %v80_v5  ;;  %p177_p0 = por %p176_p13, %p175_p12 }
  0x28   :  { %v66_v15 = vmul.f32 %v64_v8, %v64_v8  ;;  %v83_v16 = vmul.f32 %v81_v10, %v81_v10  ;;  %v58_v32 = vstv %s35_s1  ;;  %v75_v33 = vstv %s115_s8 }
  0x29   :  { %v52_v18 = vmul.f32 %v51_v7, %v49_v11  ;;  %v53_v19 = vmul.f32 %v51_v7, %v50_v13  ;;  %v67_v20 = vmul.f32 %v65_v14, %v65_v14  ;;  %v84_v23 = vmul.f32 %v82_v17, %v82_v17  ;;  %p178_p1 = pnand %p177_p0, %p171_p11 }
  0x2a   :  { %v69_v21 = vmul.f32 %v68_v9, %v66_v15  ;;  %v86_v22 = vmul.f32 %v85_v12, %v83_v16  ;;  %v92_v35 = vstv %s116_s9 }
  0x2b   :  { %v54_v24 = vmul.f32 1.442695, %v52_v18  ;;  %v70_v25 = vmul.f32 %v68_v9, %v67_v20  ;;  %v56_v28 = vmul.f32 1.442695, %v53_v19  ;;  %v87_v29 = vmul.f32 %v85_v12, %v84_v23 }
  0x2c   :  { %v71_v26 = vmul.f32 1.442695, %v69_v21  ;;  %v88_v27 = vmul.f32 1.442695, %v86_v22 }
  0x2d   :  { %126 = vpow2.f32 %v54_v24  ;;  %v73_v30 = vmul.f32 1.442695, %v70_v25  ;;  %v90_v31 = vmul.f32 1.442695, %v87_v29 }
  0x2e   :  { %128 = vpow2.f32 %v71_v26 }
  0x2f   :  { %130 = vpow2.f32 %v88_v27 }
  0x30   :  { %132 = vpow2.f32 %v56_v28 }
  0x31   :  { %134 = vpow2.f32 %v73_v30 }
  0x32   :  { %136 = vpow2.f32 %v90_v31 }
  0x37   :  { %v127_v34 = vpop.eup %126 }
  0x38   :  { %v129_v36 = vpop.eup %128  ;;  %v59_v37 = vmul.f32 %v127_v34, %v58_v32 }
  0x39   :  { %v131_v38 = vpop.eup %130  ;;  %v76_v39 = vmul.f32 %v129_v36, %v75_v33 }
  0x3a   :  { %v133_v40 = vpop.eup %132  ;;  %v93_v41 = vmul.f32 %v131_v38, %v92_v35 }
  0x3b   :  { %v135_v42 = vpop.eup %134  ;;  %v78_v43 = vadd.f32 %v76_v39, %v59_v37  ;;  %v60_v44 = vmul.f32 %v133_v40, %v58_v32 }
  0x3c   :  { %v137_v45 = vpop.eup %136  ;;  %v77_v46 = vmul.f32 %v135_v42, %v75_v33 }
  0x3d   :  { %v95_v47 = vadd.f32 %v93_v41, %v78_v43  ;;  %v94_v48 = vmul.f32 %v137_v45, %v92_v35 }
  0x3e   :  { %v79_v49 = vadd.f32 %v77_v46, %v60_v44 }
  0x3f   :  { %97 = vst [vmem:[#allocation7] sm:$0xff] %v95_v47 }
  0x40   :  { %v96_v50 = vadd.f32 %v94_v48, %v79_v49 }
  0x42   :  { %98 = vst [vmem:[#allocation7 + $0x8] sm:$0xff] %v96_v50 }
  0x43   :  { %181 = shalt.err (!%p178_p1)
}
  0x44   :  { %s182_s15 = scalar_lea.hbm %s254_s2, 256 }
  0x45   :  { %p183_p2 = scmp.ne.s32.totalorder %s254_s2, %s182_s15  ;;  %p186_p3 = scmp.lt.u32.totalorder %s182_s15, %s254_s2 }
  0x47   :  { %p188_p4 = pnand %p186_p3, %p183_p2 }
  0x49   :  { %191 = shalt.err (!%p188_p4)
}
  0x4a   :  { %108 = dma.vmem_to_hbm [thread:$0]  %s106_s11, 256, %s254_s2, [#allocation4]  }
  0x4b   :  { %196 = dma.done.wait [#allocation4], 256  }
  0x4c   :  { %197 = vsyncadd [#allocation4], 4294967040 }
  0x4d   :  { %112 = vsyncpa [#allocation3], 1 }
  0x4e   :  { %113 = vsyncpa [#allocation4], 1 }
  0x4f   :  { %114 = vsyncpa [#allocation5], 1 }

</bundles_post_ra>
